<compile_context>
chip_gen: v5e
topology: v5e:2x2
jax: 0.10.0
libtpu: 0.0.40
codegen_flags: <defaults>
</compile_context>

<pallas_src>
import functools

import jax
import jax.numpy as jnp
from jax.experimental import pallas as pl
from jax.experimental.pallas import tpu as pltpu


# ----------------------------------------------------------------------------
# Pallas kernel: one time-chunk of one direction per grid step.
# ----------------------------------------------------------------------------
def _bilstm_chunk_kernel(xw_ref, whh_ref, h0_ref, c0_ref,
                         out_ref, hN_ref, cN_ref,
                         h_scr, c_scr, *, tc, hid):
    d = pl.program_id(0)              # 0 = forward, 1 = backward
    c = pl.program_id(1)              # chunk index along the sequential axis
    is_fwd = d == 0

    @pl.when(c == 0)
    def _():                          # (re)initialize the carry for this direction
        h_scr[...] = h0_ref[0]
        c_scr[...] = c0_ref[0]

    whh = whh_ref[0]                  # (H, 4H)  recurrent weight (resident)
    xw_chunk = xw_ref[0]              # (Tc, B, 4H)  hoisted x@W_ih^T + bias

    H = hid
    h_prev = h_scr[...]               # keep carry in vregs within the chunk
    c_prev = c_scr[...]
    hs = []
    for j in range(tc):               # static unroll over the chunk
        # forward: local step j; backward: local step Tc-1-j (static slices,
        # one select on the grid-constant direction flag).
        xw_t = jnp.where(is_fwd, xw_chunk[j], xw_chunk[tc - 1 - j])
        gates = xw_t + jnp.dot(h_prev, whh, preferred_element_type=jnp.float32)
        i_g = jax.nn.sigmoid(gates[:, 0 * H:1 * H])
        f_g = jax.nn.sigmoid(gates[:, 1 * H:2 * H])
        g_g = jnp.tanh(gates[:, 2 * H:3 * H])
        o_g = jax.nn.sigmoid(gates[:, 3 * H:4 * H])
        c_prev = f_g * c_prev + i_g * g_g
        h_prev = o_g * jnp.tanh(c_prev)
        hs.append(h_prev)

    h_scr[...] = h_prev               # write carry back once per chunk
    c_scr[...] = c_prev

    # Scatter chunk outputs back to their original time slots (static stores).
    for p in range(tc):
        out_ref[0, p] = jnp.where(is_fwd, hs[p], hs[tc - 1 - p])

    # Final (h, c) only on the last chunk of each direction.
    @pl.when(c == pl.num_programs(1) - 1)
    def _():
        hN_ref[0] = h_scr[...]
        cN_ref[0] = c_scr[...]


def _bilstm_pallas(xw, whh_t, h0, c0, *, tc):
    """xw: (2, T, B, 4H) hoisted projection; whh_t: (2, H, 4H); h0/c0: (2, B, H)."""
    _, T, B, G = xw.shape
    H = h0.shape[-1]
    assert T % tc == 0
    n_chunks = T // tc

    # forward: chunk c -> time block c ; backward: chunk c -> time block nC-1-c
    def time_blk(d, c):
        return c + d * (n_chunks - 1 - 2 * c)

    grid_spec = pltpu.PrefetchScalarGridSpec(
        num_scalar_prefetch=0,
        grid=(2, n_chunks),
        in_specs=[
            pl.BlockSpec((1, tc, B, G), lambda d, c: (d, time_blk(d, c), 0, 0)),
            pl.BlockSpec((1, H, G), lambda d, c: (d, 0, 0)),
            pl.BlockSpec((1, B, H), lambda d, c: (d, 0, 0)),
            pl.BlockSpec((1, B, H), lambda d, c: (d, 0, 0)),
        ],
        out_specs=[
            pl.BlockSpec((1, tc, B, H), lambda d, c: (d, time_blk(d, c), 0, 0)),
            pl.BlockSpec((1, B, H), lambda d, c: (d, 0, 0)),
            pl.BlockSpec((1, B, H), lambda d, c: (d, 0, 0)),
        ],
        scratch_shapes=[
            pltpu.VMEM((B, H), jnp.float32),   # h carry
            pltpu.VMEM((B, H), jnp.float32),   # c carry
        ],
    )

    out_shapes = (
        jax.ShapeDtypeStruct((2, T, B, H), jnp.float32),
        jax.ShapeDtypeStruct((2, B, H), jnp.float32),
        jax.ShapeDtypeStruct((2, B, H), jnp.float32),
    )

    kernel = functools.partial(_bilstm_chunk_kernel, tc=tc, hid=H)
    return pl.pallas_call(
        kernel,
        grid_spec=grid_spec,
        out_shape=out_shapes,
        compiler_params=pltpu.CompilerParams(
            dimension_semantics=("parallel", "arbitrary")),
    )(xw, whh_t, h0, c0)


# ----------------------------------------------------------------------------
# BiLSTM forward (glue in plain JAX).
# ----------------------------------------------------------------------------
def bilstm_forward(x, params, *, tc=4):
    """x: (T, B, I).  Returns ((B, T, 2H), ((B, 2H), (B, 2H)))."""
    T, B, _ = x.shape
    H = params["fw_h0"].shape[1]

    tc = min(tc, T)
    while T % tc:
        tc -= 1

    # Hoisted input projection for both directions: one big MXU GEMM each,
    # with both LSTMCell biases folded in (removes them from the serial loop).
    # TODO(synk): for production sizes cast matmul operands to bf16 (keep gate
    # math f32) and re-derive tiling for v7x's 64 MiB VMEM.
    xw_fw = jnp.einsum("tbi,gi->tbg", x, params["fw_w_ih"],
                       precision=jax.lax.Precision.HIGHEST) \
        + (params["fw_b_ih"] + params["fw_b_hh"])
    xw_bw = jnp.einsum("tbi,gi->tbg", x, params["bw_w_ih"],
                       precision=jax.lax.Precision.HIGHEST) \
        + (params["bw_b_ih"] + params["bw_b_hh"])

    xw = jnp.stack([xw_fw, xw_bw], axis=0).astype(jnp.float32)        # (2,T,B,4H)
    whh_t = jnp.stack([params["fw_w_hh"].T, params["bw_w_hh"].T],
                      axis=0).astype(jnp.float32)                     # (2,H,4H)
    h0 = jnp.stack([params["fw_h0"], params["bw_h0"]], axis=0)        # (2,B,H)
    c0 = jnp.stack([params["fw_c0"], params["bw_c0"]], axis=0)        # (2,B,H)

    out, h_fin, c_fin = _bilstm_pallas(xw, whh_t, h0, c0, tc=tc)

    output = jnp.concatenate([out[0], out[1]], axis=2)                # (T,B,2H)
    hidd = jnp.concatenate([h_fin[0], h_fin[1]], axis=1)              # (B,2H)
    cell = jnp.concatenate([c_fin[0], c_fin[1]], axis=1)              # (B,2H)
    return jnp.transpose(output, (1, 0, 2)), (hidd, cell)


# ----------------------------------------------------------------------------
# Pure-JAX reference (lax.scan) for the correctness check.
# ----------------------------------------------------------------------------
def _lstm_ref(x, w_ih, w_hh, b_ih, b_hh, h0, c0, reverse):
    def step(carry, xt):
        h, c = carry
        gates = (xt @ w_ih.T + b_ih
                 + jnp.dot(h, w_hh.T, precision=jax.lax.Precision.HIGHEST)
                 + b_hh)
        i, f, g, o = jnp.split(gates, 4, axis=1)
        i, f, g, o = (jax.nn.sigmoid(i), jax.nn.sigmoid(f),
                      jnp.tanh(g), jax.nn.sigmoid(o))
        c = f * c + i * g
        h = o * jnp.tanh(c)
        return (h, c), h

    xs = x[::-1] if reverse else x
    (h, c), outs = jax.lax.scan(step, (h0, c0), xs)
    if reverse:
        outs = outs[::-1]
    return outs, h, c


def bilstm_ref(x, p):
    fo, fh, fc = _lstm_ref(x, p["fw_w_ih"], p["fw_w_hh"], p["fw_b_ih"],
                           p["fw_b_hh"], p["fw_h0"], p["fw_c0"], False)
    bo, bh, bc = _lstm_ref(x, p["bw_w_ih"], p["bw_w_hh"], p["bw_b_ih"],
                           p["bw_b_hh"], p["bw_h0"], p["bw_c0"], True)
    return (jnp.transpose(jnp.concatenate([fo, bo], axis=2), (1, 0, 2)),
            (jnp.concatenate([fh, bh], axis=1),
             jnp.concatenate([fc, bc], axis=1)))


# ----------------------------------------------------------------------------
# Deterministic parameter / state init.
# ----------------------------------------------------------------------------
def init_params(key, inp_size, hid_size, batch):
    ks = jax.random.split(key, 12)
    bound = 1.0 / jnp.sqrt(hid_size)              # PyTorch LSTMCell uniform init
    xav_std = jnp.sqrt(2.0 / (batch + hid_size))  # xavier_normal_ for h0/c0

    def u(k, shape):
        return jax.random.uniform(k, shape, jnp.float32, -bound, bound)

    return {
        "fw_w_ih": u(ks[0], (4 * hid_size, inp_size)),
        "fw_w_hh": u(ks[1], (4 * hid_size, hid_size)),
        "fw_b_ih": u(ks[2], (4 * hid_size,)),
        "fw_b_hh": u(ks[3], (4 * hid_size,)),
        "bw_w_ih": u(ks[4], (4 * hid_size, inp_size)),
        "bw_w_hh": u(ks[5], (4 * hid_size, hid_size)),
        "bw_b_ih": u(ks[6], (4 * hid_size,)),
        "bw_b_hh": u(ks[7], (4 * hid_size,)),
        # In the PyTorch module h0/c0 are xavier_normal_ drawn each forward;
        # here drawn once deterministically from a fixed key.
        "fw_h0": xav_std * jax.random.normal(ks[8], (batch, hid_size), jnp.float32),
        "fw_c0": xav_std * jax.random.normal(ks[9], (batch, hid_size), jnp.float32),
        "bw_h0": xav_std * jax.random.normal(ks[10], (batch, hid_size), jnp.float32),
        "bw_c0": xav_std * jax.random.normal(ks[11], (batch, hid_size), jnp.float32),
    }


if __name__ == "__main__":
    T, B, I, H = 8, 2, 16, 32
    key = jax.random.PRNGKey(0)
    k_x, k_p = jax.random.split(key)
    x = jax.random.normal(k_x, (T, B, I), jnp.float32)
    params = init_params(k_p, I, H, B)

    out, (hidd, cell) = bilstm_forward(x, params, tc=4)
    jax.block_until_ready((out, hidd, cell))

    assert out.shape == (B, T, 2 * H)
    assert hidd.shape == (B, 2 * H) and cell.shape == (B, 2 * H)

    ref_out, (ref_h, ref_c) = bilstm_ref(x, params)
    assert jnp.allclose(out, ref_out, atol=1e-4, rtol=1e-4)
    assert jnp.allclose(hidd, ref_h, atol=1e-4, rtol=1e-4)
    assert jnp.allclose(cell, ref_c, atol=1e-4, rtol=1e-4)

    print("KERNEL_OK")
</pallas_src>

<mosaic_0001>
module attributes {stable_mosaic.version = 11 : i64} {
  func.func @_bilstm_chunk_kernel(%arg0: i32, %arg1: i32, %arg2: memref<1x4x2x128xf32, #tpu.memory_space<vmem>>, %arg3: memref<1x32x128xf32, #tpu.memory_space<vmem>>, %arg4: memref<1x2x32xf32, #tpu.memory_space<vmem>>, %arg5: memref<1x2x32xf32, #tpu.memory_space<vmem>>, %arg6: memref<1x4x2x32xf32, #tpu.memory_space<vmem>>, %arg7: memref<1x2x32xf32, #tpu.memory_space<vmem>>, %arg8: memref<1x2x32xf32, #tpu.memory_space<vmem>>, %arg9: memref<2x32xf32, #tpu.memory_space<vmem>>, %arg10: memref<2x32xf32, #tpu.memory_space<vmem>>) attributes {dimension_semantics = [#tpu.dimension_semantics<parallel>, #tpu.dimension_semantics<arbitrary>], iteration_bounds = array<i64: 2, 2>, scalar_prefetch = 0 : i64, scratch_operands = 2 : i64, tpu.core_type = #tpu.core_type<tc>, window_params = [{transform_indices = @transform_0, window_bounds = array<i64: 1, 4, 2, 128>}, {transform_indices = @transform_1, window_bounds = array<i64: 1, 32, 128>}, {transform_indices = @transform_2, window_bounds = array<i64: 1, 2, 32>}, {transform_indices = @transform_3, window_bounds = array<i64: 1, 2, 32>}, {transform_indices = @transform_4, window_bounds = array<i64: 1, 4, 2, 32>}, {transform_indices = @transform_5, window_bounds = array<i64: 1, 2, 32>}, {transform_indices = @transform_6, window_bounds = array<i64: 1, 2, 32>}]} {
    %c0_i32 = arith.constant 0 : i32
    %0 = arith.cmpi eq, %arg0, %c0_i32 : i32
    %c0_i32_0 = arith.constant 0 : i32
    %1 = arith.cmpi eq, %arg1, %c0_i32_0 : i32
    %2 = arith.extui %1 : i1 to i32
    %c0_i32_1 = arith.constant 0 : i32
    %3 = arith.cmpi ne, %2, %c0_i32_1 : i32
    scf.if %3 {
      %c0_45 = arith.constant 0 : index
      %c0_46 = arith.constant 0 : index
      %c0_47 = arith.constant 0 : index
      %159 = vector.load %arg4[%c0_45, %c0_46, %c0_47] : memref<1x2x32xf32, #tpu.memory_space<vmem>>, vector<1x2x32xf32>
      %160 = vector.shape_cast %159 : vector<1x2x32xf32> to vector<2x32xf32>
      %c0_48 = arith.constant 0 : index
      %c0_49 = arith.constant 0 : index
      %161 = vector.load %arg9[%c0_48, %c0_49] : memref<2x32xf32, #tpu.memory_space<vmem>>, vector<2x32xf32>
      tpu.vector_store %arg9[%c0_48, %c0_49], %160 {strides = array<i32>} : memref<2x32xf32, #tpu.memory_space<vmem>>, vector<2x32xf32>,
      %c0_50 = arith.constant 0 : index
      %c0_51 = arith.constant 0 : index
      %c0_52 = arith.constant 0 : index
      %162 = vector.load %arg5[%c0_50, %c0_51, %c0_52] : memref<1x2x32xf32, #tpu.memory_space<vmem>>, vector<1x2x32xf32>
      %163 = vector.shape_cast %162 : vector<1x2x32xf32> to vector<2x32xf32>
      %c0_53 = arith.constant 0 : index
      %c0_54 = arith.constant 0 : index
      %164 = vector.load %arg10[%c0_53, %c0_54] : memref<2x32xf32, #tpu.memory_space<vmem>>, vector<2x32xf32>
      tpu.vector_store %arg10[%c0_53, %c0_54], %163 {strides = array<i32>} : memref<2x32xf32, #tpu.memory_space<vmem>>, vector<2x32xf32>,
    } else {
    }
    %c0 = arith.constant 0 : index
    %c0_2 = arith.constant 0 : index
    %c0_3 = arith.constant 0 : index
    %4 = vector.load %arg3[%c0, %c0_2, %c0_3] : memref<1x32x128xf32, #tpu.memory_space<vmem>>, vector<1x32x128xf32>
    %5 = vector.shape_cast %4 : vector<1x32x128xf32> to vector<32x128xf32>
    %c0_4 = arith.constant 0 : index
    %c0_5 = arith.constant 0 : index
    %c0_6 = arith.constant 0 : index
    %c0_7 = arith.constant 0 : index
    %6 = vector.load %arg2[%c0_4, %c0_5, %c0_6, %c0_7] : memref<1x4x2x128xf32, #tpu.memory_space<vmem>>, vector<1x4x2x128xf32>
    %7 = vector.shape_cast %6 : vector<1x4x2x128xf32> to vector<4x2x128xf32>
    %c0_8 = arith.constant 0 : index
    %c0_9 = arith.constant 0 : index
    %8 = vector.load %arg9[%c0_8, %c0_9] : memref<2x32xf32, #tpu.memory_space<vmem>>, vector<2x32xf32>
    %c0_10 = arith.constant 0 : index
    %c0_11 = arith.constant 0 : index
    %9 = vector.load %arg10[%c0_10, %c0_11] : memref<2x32xf32, #tpu.memory_space<vmem>>, vector<2x32xf32>
    %10 = vector.extract_strided_slice %7 {offsets = [0, 0, 0], sizes = [1, 2, 128], strides = [1, 1, 1]} : vector<4x2x128xf32> to vector<1x2x128xf32>
    %11 = vector.shape_cast %10 : vector<1x2x128xf32> to vector<2x128xf32>
    %12 = vector.extract_strided_slice %7 {offsets = [3, 0, 0], sizes = [1, 2, 128], strides = [1, 1, 1]} : vector<4x2x128xf32> to vector<1x2x128xf32>
    %13 = vector.shape_cast %12 : vector<1x2x128xf32> to vector<2x128xf32>
    %14 = arith.select %0, %11, %13 : vector<2x128xf32>
    %cst = arith.constant dense<0.000000e+00> : vector<2x128xf32>
    %15 = tpu.matmul %8, %5, %cst {dimension_numbers = #tpu.dot_dimension_numbers<[1], [0], [0], [1], [0, 0, 1, 1], [], []>} : vector<2x32xf32>, vector<32x128xf32>, vector<2x128xf32> -> vector<2x128xf32>
    %16 = arith.addf %14, %15 : vector<2x128xf32>
    %17 = vector.extract_strided_slice %16 {offsets = [0, 0], sizes = [2, 32], strides = [1, 1]} : vector<2x128xf32> to vector<2x32xf32>
    %18 = arith.negf %17 : vector<2x32xf32>
    %19 = math.exp %18 : vector<2x32xf32>
    %cst_12 = arith.constant 1.000000e+00 : f32
    %20 = vector.broadcast %cst_12 : f32 to vector<2x32xf32>
    %21 = arith.addf %20, %19 : vector<2x32xf32>
    %22 = arith.divf %20, %21 : vector<2x32xf32>
    %23 = vector.extract_strided_slice %16 {offsets = [0, 32], sizes = [2, 32], strides = [1, 1]} : vector<2x128xf32> to vector<2x32xf32>
    %24 = arith.negf %23 : vector<2x32xf32>
    %25 = math.exp %24 : vector<2x32xf32>
    %cst_13 = arith.constant 1.000000e+00 : f32
    %26 = vector.broadcast %cst_13 : f32 to vector<2x32xf32>
    %27 = arith.addf %26, %25 : vector<2x32xf32>
    %28 = arith.divf %26, %27 : vector<2x32xf32>
    %29 = vector.extract_strided_slice %16 {offsets = [0, 64], sizes = [2, 32], strides = [1, 1]} : vector<2x128xf32> to vector<2x32xf32>
    %30 = math.tanh %29 : vector<2x32xf32>
    %31 = vector.extract_strided_slice %16 {offsets = [0, 96], sizes = [2, 32], strides = [1, 1]} : vector<2x128xf32> to vector<2x32xf32>
    %32 = arith.negf %31 : vector<2x32xf32>
    %33 = math.exp %32 : vector<2x32xf32>
    %cst_14 = arith.constant 1.000000e+00 : f32
    %34 = vector.broadcast %cst_14 : f32 to vector<2x32xf32>
    %35 = arith.addf %34, %33 : vector<2x32xf32>
    %36 = arith.divf %34, %35 : vector<2x32xf32>
    %37 = arith.mulf %28, %9 : vector<2x32xf32>
    %38 = arith.mulf %22, %30 : vector<2x32xf32>
    %39 = arith.addf %37, %38 : vector<2x32xf32>
    %40 = math.tanh %39 : vector<2x32xf32>
    %41 = arith.mulf %36, %40 : vector<2x32xf32>
    %42 = vector.extract_strided_slice %7 {offsets = [1, 0, 0], sizes = [1, 2, 128], strides = [1, 1, 1]} : vector<4x2x128xf32> to vector<1x2x128xf32>
    %43 = vector.shape_cast %42 : vector<1x2x128xf32> to vector<2x128xf32>
    %44 = vector.extract_strided_slice %7 {offsets = [2, 0, 0], sizes = [1, 2, 128], strides = [1, 1, 1]} : vector<4x2x128xf32> to vector<1x2x128xf32>
    %45 = vector.shape_cast %44 : vector<1x2x128xf32> to vector<2x128xf32>
    %46 = arith.select %0, %43, %45 : vector<2x128xf32>
    %cst_15 = arith.constant dense<0.000000e+00> : vector<2x128xf32>
    %47 = tpu.matmul %41, %5, %cst_15 {dimension_numbers = #tpu.dot_dimension_numbers<[1], [0], [0], [1], [0, 0, 1, 1], [], []>} : vector<2x32xf32>, vector<32x128xf32>, vector<2x128xf32> -> vector<2x128xf32>
    %48 = arith.addf %46, %47 : vector<2x128xf32>
    %49 = vector.extract_strided_slice %48 {offsets = [0, 0], sizes = [2, 32], strides = [1, 1]} : vector<2x128xf32> to vector<2x32xf32>
    %50 = arith.negf %49 : vector<2x32xf32>
    %51 = math.exp %50 : vector<2x32xf32>
    %cst_16 = arith.constant 1.000000e+00 : f32
    %52 = vector.broadcast %cst_16 : f32 to vector<2x32xf32>
    %53 = arith.addf %52, %51 : vector<2x32xf32>
    %54 = arith.divf %52, %53 : vector<2x32xf32>
    %55 = vector.extract_strided_slice %48 {offsets = [0, 32], sizes = [2, 32], strides = [1, 1]} : vector<2x128xf32> to vector<2x32xf32>
    %56 = arith.negf %55 : vector<2x32xf32>
    %57 = math.exp %56 : vector<2x32xf32>
    %cst_17 = arith.constant 1.000000e+00 : f32
    %58 = vector.broadcast %cst_17 : f32 to vector<2x32xf32>
    %59 = arith.addf %58, %57 : vector<2x32xf32>
    %60 = arith.divf %58, %59 : vector<2x32xf32>
    %61 = vector.extract_strided_slice %48 {offsets = [0, 64], sizes = [2, 32], strides = [1, 1]} : vector<2x128xf32> to vector<2x32xf32>
    %62 = math.tanh %61 : vector<2x32xf32>
    %63 = vector.extract_strided_slice %48 {offsets = [0, 96], sizes = [2, 32], strides = [1, 1]} : vector<2x128xf32> to vector<2x32xf32>
    %64 = arith.negf %63 : vector<2x32xf32>
    %65 = math.exp %64 : vector<2x32xf32>
    %cst_18 = arith.constant 1.000000e+00 : f32
    %66 = vector.broadcast %cst_18 : f32 to vector<2x32xf32>
    %67 = arith.addf %66, %65 : vector<2x32xf32>
    %68 = arith.divf %66, %67 : vector<2x32xf32>
    %69 = arith.mulf %60, %39 : vector<2x32xf32>
    %70 = arith.mulf %54, %62 : vector<2x32xf32>
    %71 = arith.addf %69, %70 : vector<2x32xf32>
    %72 = math.tanh %71 : vector<2x32xf32>
    %73 = arith.mulf %68, %72 : vector<2x32xf32>
    %74 = vector.extract_strided_slice %7 {offsets = [2, 0, 0], sizes = [1, 2, 128], strides = [1, 1, 1]} : vector<4x2x128xf32> to vector<1x2x128xf32>
    %75 = vector.shape_cast %74 : vector<1x2x128xf32> to vector<2x128xf32>
    %76 = vector.extract_strided_slice %7 {offsets = [1, 0, 0], sizes = [1, 2, 128], strides = [1, 1, 1]} : vector<4x2x128xf32> to vector<1x2x128xf32>
    %77 = vector.shape_cast %76 : vector<1x2x128xf32> to vector<2x128xf32>
    %78 = arith.select %0, %75, %77 : vector<2x128xf32>
    %cst_19 = arith.constant dense<0.000000e+00> : vector<2x128xf32>
    %79 = tpu.matmul %73, %5, %cst_19 {dimension_numbers = #tpu.dot_dimension_numbers<[1], [0], [0], [1], [0, 0, 1, 1], [], []>} : vector<2x32xf32>, vector<32x128xf32>, vector<2x128xf32> -> vector<2x128xf32>
    %80 = arith.addf %78, %79 : vector<2x128xf32>
    %81 = vector.extract_strided_slice %80 {offsets = [0, 0], sizes = [2, 32], strides = [1, 1]} : vector<2x128xf32> to vector<2x32xf32>
    %82 = arith.negf %81 : vector<2x32xf32>
    %83 = math.exp %82 : vector<2x32xf32>
    %cst_20 = arith.constant 1.000000e+00 : f32
    %84 = vector.broadcast %cst_20 : f32 to vector<2x32xf32>
    %85 = arith.addf %84, %83 : vector<2x32xf32>
    %86 = arith.divf %84, %85 : vector<2x32xf32>
    %87 = vector.extract_strided_slice %80 {offsets = [0, 32], sizes = [2, 32], strides = [1, 1]} : vector<2x128xf32> to vector<2x32xf32>
    %88 = arith.negf %87 : vector<2x32xf32>
    %89 = math.exp %88 : vector<2x32xf32>
    %cst_21 = arith.constant 1.000000e+00 : f32
    %90 = vector.broadcast %cst_21 : f32 to vector<2x32xf32>
    %91 = arith.addf %90, %89 : vector<2x32xf32>
    %92 = arith.divf %90, %91 : vector<2x32xf32>
    %93 = vector.extract_strided_slice %80 {offsets = [0, 64], sizes = [2, 32], strides = [1, 1]} : vector<2x128xf32> to vector<2x32xf32>
    %94 = math.tanh %93 : vector<2x32xf32>
    %95 = vector.extract_strided_slice %80 {offsets = [0, 96], sizes = [2, 32], strides = [1, 1]} : vector<2x128xf32> to vector<2x32xf32>
    %96 = arith.negf %95 : vector<2x32xf32>
    %97 = math.exp %96 : vector<2x32xf32>
    %cst_22 = arith.constant 1.000000e+00 : f32
    %98 = vector.broadcast %cst_22 : f32 to vector<2x32xf32>
    %99 = arith.addf %98, %97 : vector<2x32xf32>
    %100 = arith.divf %98, %99 : vector<2x32xf32>
    %101 = arith.mulf %92, %71 : vector<2x32xf32>
    %102 = arith.mulf %86, %94 : vector<2x32xf32>
    %103 = arith.addf %101, %102 : vector<2x32xf32>
    %104 = math.tanh %103 : vector<2x32xf32>
    %105 = arith.mulf %100, %104 : vector<2x32xf32>
    %106 = vector.extract_strided_slice %7 {offsets = [3, 0, 0], sizes = [1, 2, 128], strides = [1, 1, 1]} : vector<4x2x128xf32> to vector<1x2x128xf32>
    %107 = vector.shape_cast %106 : vector<1x2x128xf32> to vector<2x128xf32>
    %108 = vector.extract_strided_slice %7 {offsets = [0, 0, 0], sizes = [1, 2, 128], strides = [1, 1, 1]} : vector<4x2x128xf32> to vector<1x2x128xf32>
    %109 = vector.shape_cast %108 : vector<1x2x128xf32> to vector<2x128xf32>
    %110 = arith.select %0, %107, %109 : vector<2x128xf32>
    %cst_23 = arith.constant dense<0.000000e+00> : vector<2x128xf32>
    %111 = tpu.matmul %105, %5, %cst_23 {dimension_numbers = #tpu.dot_dimension_numbers<[1], [0], [0], [1], [0, 0, 1, 1], [], []>} : vector<2x32xf32>, vector<32x128xf32>, vector<2x128xf32> -> vector<2x128xf32>
    %112 = arith.addf %110, %111 : vector<2x128xf32>
    %113 = vector.extract_strided_slice %112 {offsets = [0, 0], sizes = [2, 32], strides = [1, 1]} : vector<2x128xf32> to vector<2x32xf32>
    %114 = arith.negf %113 : vector<2x32xf32>
    %115 = math.exp %114 : vector<2x32xf32>
    %cst_24 = arith.constant 1.000000e+00 : f32
    %116 = vector.broadcast %cst_24 : f32 to vector<2x32xf32>
    %117 = arith.addf %116, %115 : vector<2x32xf32>
    %118 = arith.divf %116, %117 : vector<2x32xf32>
    %119 = vector.extract_strided_slice %112 {offsets = [0, 32], sizes = [2, 32], strides = [1, 1]} : vector<2x128xf32> to vector<2x32xf32>
    %120 = arith.negf %119 : vector<2x32xf32>
    %121 = math.exp %120 : vector<2x32xf32>
    %cst_25 = arith.constant 1.000000e+00 : f32
    %122 = vector.broadcast %cst_25 : f32 to vector<2x32xf32>
    %123 = arith.addf %122, %121 : vector<2x32xf32>
    %124 = arith.divf %122, %123 : vector<2x32xf32>
    %125 = vector.extract_strided_slice %112 {offsets = [0, 64], sizes = [2, 32], strides = [1, 1]} : vector<2x128xf32> to vector<2x32xf32>
    %126 = math.tanh %125 : vector<2x32xf32>
    %127 = vector.extract_strided_slice %112 {offsets = [0, 96], sizes = [2, 32], strides = [1, 1]} : vector<2x128xf32> to vector<2x32xf32>
    %128 = arith.negf %127 : vector<2x32xf32>
    %129 = math.exp %128 : vector<2x32xf32>
    %cst_26 = arith.constant 1.000000e+00 : f32
    %130 = vector.broadcast %cst_26 : f32 to vector<2x32xf32>
    %131 = arith.addf %130, %129 : vector<2x32xf32>
    %132 = arith.divf %130, %131 : vector<2x32xf32>
    %133 = arith.mulf %124, %103 : vector<2x32xf32>
    %134 = arith.mulf %118, %126 : vector<2x32xf32>
    %135 = arith.addf %133, %134 : vector<2x32xf32>
    %136 = math.tanh %135 : vector<2x32xf32>
    %137 = arith.mulf %132, %136 : vector<2x32xf32>
    %c0_27 = arith.constant 0 : index
    %c0_28 = arith.constant 0 : index
    %138 = vector.load %arg9[%c0_27, %c0_28] : memref<2x32xf32, #tpu.memory_space<vmem>>, vector<2x32xf32>
    tpu.vector_store %arg9[%c0_27, %c0_28], %137 {strides = array<i32>} : memref<2x32xf32, #tpu.memory_space<vmem>>, vector<2x32xf32>,
    %c0_29 = arith.constant 0 : index
    %c0_30 = arith.constant 0 : index
    %139 = vector.load %arg10[%c0_29, %c0_30] : memref<2x32xf32, #tpu.memory_space<vmem>>, vector<2x32xf32>
    tpu.vector_store %arg10[%c0_29, %c0_30], %135 {strides = array<i32>} : memref<2x32xf32, #tpu.memory_space<vmem>>, vector<2x32xf32>,
    %140 = arith.select %0, %41, %137 : vector<2x32xf32>
    %c0_31 = arith.constant 0 : index
    %c0_32 = arith.constant 0 : index
    %c0_33 = arith.constant 0 : index
    %c0_34 = arith.constant 0 : index
    %141 = vector.load %arg6[%c0_31, %c0_32, %c0_33, %c0_34] : memref<1x4x2x32xf32, #tpu.memory_space<vmem>>, vector<1x1x2x32xf32>
    %142 = vector.shape_cast %141 : vector<1x1x2x32xf32> to vector<2x32xf32>
    %143 = vector.shape_cast %140 : vector<2x32xf32> to vector<1x1x2x32xf32>
    tpu.vector_store %arg6[%c0_31, %c0_32, %c0_33, %c0_34], %143 {strides = array<i32>} : memref<1x4x2x32xf32, #tpu.memory_space<vmem>>, vector<1x1x2x32xf32>,
    %144 = arith.select %0, %73, %105 : vector<2x32xf32>
    %c0_35 = arith.constant 0 : index
    %c1 = arith.constant 1 : index
    %c0_36 = arith.constant 0 : index
    %c0_37 = arith.constant 0 : index
    %145 = vector.load %arg6[%c0_35, %c1, %c0_36, %c0_37] : memref<1x4x2x32xf32, #tpu.memory_space<vmem>>, vector<1x1x2x32xf32>
    %146 = vector.shape_cast %145 : vector<1x1x2x32xf32> to vector<2x32xf32>
    %147 = vector.shape_cast %144 : vector<2x32xf32> to vector<1x1x2x32xf32>
    tpu.vector_store %arg6[%c0_35, %c1, %c0_36, %c0_37], %147 {strides = array<i32>} : memref<1x4x2x32xf32, #tpu.memory_space<vmem>>, vector<1x1x2x32xf32>,
    %148 = arith.select %0, %105, %73 : vector<2x32xf32>
    %c0_38 = arith.constant 0 : index
    %c2 = arith.constant 2 : index
    %c0_39 = arith.constant 0 : index
    %c0_40 = arith.constant 0 : index
    %149 = vector.load %arg6[%c0_38, %c2, %c0_39, %c0_40] : memref<1x4x2x32xf32, #tpu.memory_space<vmem>>, vector<1x1x2x32xf32>
    %150 = vector.shape_cast %149 : vector<1x1x2x32xf32> to vector<2x32xf32>
    %151 = vector.shape_cast %148 : vector<2x32xf32> to vector<1x1x2x32xf32>
    tpu.vector_store %arg6[%c0_38, %c2, %c0_39, %c0_40], %151 {strides = array<i32>} : memref<1x4x2x32xf32, #tpu.memory_space<vmem>>, vector<1x1x2x32xf32>,
    %152 = arith.select %0, %137, %41 : vector<2x32xf32>
    %c0_41 = arith.constant 0 : index
    %c3 = arith.constant 3 : index
    %c0_42 = arith.constant 0 : index
    %c0_43 = arith.constant 0 : index
    %153 = vector.load %arg6[%c0_41, %c3, %c0_42, %c0_43] : memref<1x4x2x32xf32, #tpu.memory_space<vmem>>, vector<1x1x2x32xf32>
    %154 = vector.shape_cast %153 : vector<1x1x2x32xf32> to vector<2x32xf32>
    %155 = vector.shape_cast %152 : vector<2x32xf32> to vector<1x1x2x32xf32>
    tpu.vector_store %arg6[%c0_41, %c3, %c0_42, %c0_43], %155 {strides = array<i32>} : memref<1x4x2x32xf32, #tpu.memory_space<vmem>>, vector<1x1x2x32xf32>,
    %c1_i32 = arith.constant 1 : i32
    %156 = arith.cmpi eq, %arg1, %c1_i32 : i32
    %157 = arith.extui %156 : i1 to i32
    %c0_i32_44 = arith.constant 0 : i32
    %158 = arith.cmpi ne, %157, %c0_i32_44 : i32
    scf.if %158 {
      %c0_45 = arith.constant 0 : index
      %c0_46 = arith.constant 0 : index
      %159 = vector.load %arg9[%c0_45, %c0_46] : memref<2x32xf32, #tpu.memory_space<vmem>>, vector<2x32xf32>
      %c0_47 = arith.constant 0 : index
      %c0_48 = arith.constant 0 : index
      %c0_49 = arith.constant 0 : index
      %160 = vector.load %arg7[%c0_47, %c0_48, %c0_49] : memref<1x2x32xf32, #tpu.memory_space<vmem>>, vector<1x2x32xf32>
      %161 = vector.shape_cast %160 : vector<1x2x32xf32> to vector<2x32xf32>
      %162 = vector.shape_cast %159 : vector<2x32xf32> to vector<1x2x32xf32>
      tpu.vector_store %arg7[%c0_47, %c0_48, %c0_49], %162 {strides = array<i32>} : memref<1x2x32xf32, #tpu.memory_space<vmem>>, vector<1x2x32xf32>,
      %c0_50 = arith.constant 0 : index
      %c0_51 = arith.constant 0 : index
      %163 = vector.load %arg10[%c0_50, %c0_51] : memref<2x32xf32, #tpu.memory_space<vmem>>, vector<2x32xf32>
      %c0_52 = arith.constant 0 : index
      %c0_53 = arith.constant 0 : index
      %c0_54 = arith.constant 0 : index
      %164 = vector.load %arg8[%c0_52, %c0_53, %c0_54] : memref<1x2x32xf32, #tpu.memory_space<vmem>>, vector<1x2x32xf32>
      %165 = vector.shape_cast %164 : vector<1x2x32xf32> to vector<2x32xf32>
      %166 = vector.shape_cast %163 : vector<2x32xf32> to vector<1x2x32xf32>
      tpu.vector_store %arg8[%c0_52, %c0_53, %c0_54], %166 {strides = array<i32>} : memref<1x2x32xf32, #tpu.memory_space<vmem>>, vector<1x2x32xf32>,
    } else {
    }
    return
  }
  func.func @transform_0(%arg0: i32, %arg1: i32) -> (i32, i32, i32, i32) {
    %c2_i32 = arith.constant 2 : i32
    %0 = arith.muli %c2_i32, %arg1 : i32
    %c1_i32 = arith.constant 1 : i32
    %1 = arith.subi %c1_i32, %0 : i32
    %2 = arith.muli %arg0, %1 : i32
    %3 = arith.addi %arg1, %2 : i32
    %c0_i32 = arith.constant 0 : i32
    %c0_i32_0 = arith.constant 0 : i32
    %c0_i32_1 = arith.constant 0 : i32
    return %arg0, %3, %c0_i32, %c0_i32_0 : i32, i32, i32, i32
  }
  func.func @transform_1(%arg0: i32, %arg1: i32) -> (i32, i32, i32) {
    %c0_i32 = arith.constant 0 : i32
    %c0_i32_0 = arith.constant 0 : i32
    %c0_i32_1 = arith.constant 0 : i32
    return %arg0, %c0_i32, %c0_i32_0 : i32, i32, i32
  }
  func.func @transform_2(%arg0: i32, %arg1: i32) -> (i32, i32, i32) {
    %c0_i32 = arith.constant 0 : i32
    %c0_i32_0 = arith.constant 0 : i32
    %c0_i32_1 = arith.constant 0 : i32
    return %arg0, %c0_i32, %c0_i32_0 : i32, i32, i32
  }
  func.func @transform_3(%arg0: i32, %arg1: i32) -> (i32, i32, i32) {
    %c0_i32 = arith.constant 0 : i32
    %c0_i32_0 = arith.constant 0 : i32
    %c0_i32_1 = arith.constant 0 : i32
    return %arg0, %c0_i32, %c0_i32_0 : i32, i32, i32
  }
  func.func @transform_4(%arg0: i32, %arg1: i32) -> (i32, i32, i32, i32) {
    %c2_i32 = arith.constant 2 : i32
    %0 = arith.muli %c2_i32, %arg1 : i32
    %c1_i32 = arith.constant 1 : i32
    %1 = arith.subi %c1_i32, %0 : i32
    %2 = arith.muli %arg0, %1 : i32
    %3 = arith.addi %arg1, %2 : i32
    %c0_i32 = arith.constant 0 : i32
    %c0_i32_0 = arith.constant 0 : i32
    %c0_i32_1 = arith.constant 0 : i32
    return %arg0, %3, %c0_i32, %c0_i32_0 : i32, i32, i32, i32
  }
  func.func @transform_5(%arg0: i32, %arg1: i32) -> (i32, i32, i32) {
    %c0_i32 = arith.constant 0 : i32
    %c0_i32_0 = arith.constant 0 : i32
    %c0_i32_1 = arith.constant 0 : i32
    return %arg0, %c0_i32, %c0_i32_0 : i32, i32, i32
  }
  func.func @transform_6(%arg0: i32, %arg1: i32) -> (i32, i32, i32) {
    %c0_i32 = arith.constant 0 : i32
    %c0_i32_0 = arith.constant 0 : i32
    %c0_i32_1 = arith.constant 0 : i32
    return %arg0, %c0_i32, %c0_i32_0 : i32, i32, i32
  }
}

</mosaic_0001>

<bundles_post_ra>
// kernel: tpu_custom_call.1
= control target key start
LH: loop header
LB: loop body
LE: loop exit
PB: predicated region body
PF: predicated region fallthrough
CT: control target
= control target key end

     0   :  { %s2086_s0 = inlined_call_operand.hbm [shape: f32[2,8,2,128], index: 0, kind: input, shape index: {}]   ;;  %s2087_s1 = inlined_call_operand.hbm [shape: f32[2,32,128], index: 1, kind: input, shape index: {}]   ;;  %s2088_s2 = inlined_call_operand.hbm [shape: f32[2,2,32], index: 2, kind: input, shape index: {}]   ;;  %s2089_s3 = inlined_call_operand.hbm [shape: f32[2,2,32], index: 3, kind: input, shape index: {}]   ;;  %s2090_s4 = inlined_call_operand.hbm [shape: f32[2,8,2,32], index: 4, kind: output, shape index: {0}]   ;;  %s2091_s5 = inlined_call_operand.hbm [shape: f32[2,2,32], index: 5, kind: output, shape index: {1}]   ;;  %s2092_s6 = inlined_call_operand.hbm [shape: f32[2,2,32], index: 6, kind: output, shape index: {2}]  }
   0x1   :  { %2119 = sst [smem:[#allocation36_spill]] %s2086_s0 }
   0x2   :  { %2120 = sst [smem:[#allocation37_spill]] %s2087_s1 }
   0x3   :  { %2121 = sst [smem:[#allocation38_spill]] %s2088_s2 }
   0x4   :  { %2122 = sst [smem:[#allocation39_spill]] %s2089_s3 }
   0x5   :  { %2123 = sst [smem:[#allocation40_spill]] %s2090_s4 }
   0x6   :  { %2124 = sst [smem:[#allocation41_spill]] %s2091_s5 }
   0x7   :  { %2125 = sst [smem:[#allocation42_spill]] %s2092_s6 }
   0x8   :  { %12 = vsyncpa [#allocation5], 0 }
   0x9   :  { %14 = vsyncpa [#allocation5 + $0x1], 0 }
   0xa   :  { %15 = vsyncpa [#allocation8], 0 }
   0xb   :  { %17 = vsyncpa [#allocation8 + $0x1], 0 }
   0xc   :  { %18 = vsyncpa [#allocation11], 0 }
   0xd   :  { %20 = vsyncpa [#allocation11 + $0x1], 0 }
   0xe   :  { %21 = vsyncpa [#allocation6], 0 }
   0xf   :  { %23 = vsyncpa [#allocation6 + $0x1], 0 }
  0x10   :  { %24 = vsyncpa [#allocation14], 0 }
  0x11   :  { %26 = vsyncpa [#allocation14 + $0x1], 0  ;;  %s1639_s21 = smov 0   ;;  %s1641_s22 = smov 0  }
  0x12   :  { %s1643_s23 = smov 0   ;;  %s1645_s24 = smov 0  }
  0x13   :  { %s1647_s25 = smov 0   ;;  %s1649_s26 = smov 0  }
  0x14   :  { %s1651_s27 = smov 0   ;;  %s1653_s28 = smov 0  }
  0x15   :  { %s1655_s29 = smov 0   ;;  %s1657_s30 = smov 0  }
  0x16   :  { %s1659_s7 = smov 0  }
  0x17 LB: > { %2126 = sst [smem:[#allocation21_spill]] %s1558_s22  ;;  %s1693_s8 = sadd.s32 4294967295, %s1594_s7   ;;  %s1594_s7 = sphi %s1659_s7, %s32_s7   ;;  %s1590_s30 = sphi %s1657_s30, %s2192_s30   ;;  %s1586_s29 = sphi %s1655_s29, %s2191_s29   ;;  %s1582_s28 = sphi %s1653_s28, %s2190_s28   ;;  %s1578_s27 = sphi %s1651_s27, %s2189_s27   ;;  %s1574_s26 = sphi %s1649_s26, %s2188_s26   ;;  %s1570_s25 = sphi %s1647_s25, %s2196_s25   ;;  %s1566_s24 = sphi %s1645_s24, %s2195_s24   ;;  %s1562_s23 = sphi %s1643_s23, %s2194_s23   ;;  %s1558_s22 = sphi %s1641_s22, %s2193_s22   ;;  %s1554_s21 = sphi %s1639_s21, %s2185_s21  }
  0x18   : > { %2127 = sst [smem:[#allocation22_spill]] %s1566_s24  ;;  %s2093_s9 = sadd.s32 4294967294, %s1594_s7  }
  0x19   : > { %2128 = sst [smem:[#allocation23_spill]] %s1574_s26  ;;  %p69_p0 = scmp.eq.s32.totalorder %s1594_s7, 0 }
  0x1a   : > { %2129 = sst [smem:[#allocation24_spill]] %s1578_s27  ;;  %p2101_p1 = scmp.eq.s32.totalorder %s1693_s8, 0 }
  0x1b   : > { %2130 = sst [smem:[#allocation25_spill]] %s1582_s28  ;;  %p94_p2 = scmp.ne.s32.totalorder %s1562_s23, %s1558_s22 }
  0x1c   : > { %2131 = sst [smem:[#allocation26_spill]] %s1586_s29  ;;  %p100_p3 = scmp.ne.s32.totalorder %s1558_s22, %s1554_s21 }
  0x1d   : > { %2132 = sst [smem:[#allocation27_spill]] %s1590_s30  ;;  %p186_p4 = scmp.eq.s32.totalorder %s1693_s8, 3 }
  0x1e   : > { %p1705_p5 = por %p94_p2, %p69_p0  ;;  %p1711_p6 = scmp.eq.s32.totalorder %s2093_s9, 3 }
  0x1f   : > { %p1717_p7 = por %p100_p3, %p2101_p1  ;;  %p1723_p8 = por %p186_p4, %p94_p2 }
  0x20   : > { %p1729_p9 = por %p1711_p6, %p100_p3  ;;  %p2100_p10 = scmp.lt.s32.totalorder %s1594_s7, 4 }
  0x21   : > { %s2135_s13 = scalar_select %p1717_p7, 1, 0 }
  0x22   : > { %s2137_s14 = scalar_select %p1723_p8, 1, 0 }
  0x23   : > { %2136 = sst [smem:[#allocation28_spill]] %s2135_s13  ;;  %s292_s16 = sand.u32 1, %s1594_s7  }
  0x24   : > { %2138 = sst [smem:[#allocation29_spill]] %s2137_s14  ;;  %s1736_s17 = sand.u32 1, %s1562_s23  }
  0x25   : > { %s2139_s15 = scalar_select %p1729_p9, 1, 0 }
  0x26   : > { %s1077_s18 = sshll.u32 %s1736_s17, 5  ;;  %s1116_s19 = sshll.u32 %s1590_s30, 5 }
  0x27   : > { %2140 = sst [smem:[#allocation30_spill]] %s2139_s15  ;;  %s296_s4 = scalar_lea.vmem [#allocation7], %s1077_s18 }
  0x28   : > { %s2141_s1 = sld [smem:[#allocation37_spill]]  ;;  %s304_s6 = sshll.u32 %s296_s4, 4  ;;  %s305_s6 = int_to_ptr.vmem [resolvable:$true] %s304_s6 }
  0x29   : > { %p1747_p11 = pnand %p2100_p10, %p1705_p5  ;;  %p1084_p12 = scmp.ge.s32.totalorder %s1594_s7, 1 }
  0x2a   : > { %p350_p13 = scmp.lt.s32.totalorder %s1594_s7, 5  ;;  %s1597_s4 = smov 8  }
  0x2b   : > { %s41_s18 = sadd.s32 1, %s1586_s29  ;;  %s44_s20 = sadd.s32 1, %s1590_s30 }
  0x2c   : > { %p1758_p2 = pnand %p1084_p12, %p350_p13  ;;  %p42_p3 = scmp.ge.s32.totalorder %s41_s18, 2 }
  0x2d   : > { %s61_s21 = sadd.s32 1, %s1574_s26  ;;  %p68_p12 = scmp.ne.s32.totalorder %s1574_s26, %s1570_s25 }
  0x2e   : > { %s301_s9 = scalar_lea.hbm %s2141_s1, %s1116_s19  ;;  %s1753_s19 = scalar_lea.sflag [#allocation8], %s292_s16 }
  0x2f   : > { %s302_s10 = sshll.u32 %s301_s9, 4  ;;  %s1596_s9 = smov 128   ;;  %s303_s10 = int_to_ptr.hbm [resolvable:$true] %s302_s10 }
  0x30   : > { %1137 = dma.hbm_to_vmem [thread:$0]  (!%p1747_p11), %s303_s10, 512, %s305_s6, %s1753_s19, %s1596_s9, %s1596_s9, %s1597_s4  }
  0x31   : > { %s1066_s16 = sshll.u32 %s1586_s29, 1  ;;  %s2198_s18 = smov (%p42_p3, %s41_s18), 0 }
  0x32   : > { %2144 = sst [smem:[#allocation31_spill]] %s2198_s18  ;;  %s2200_s20 = smov (!%p42_p3, %s44_s20), %s1590_s30 }
  0x33   : > { %s49_s6 = ssub.s32 1, %s1066_s16  ;;  %s1067_s10 = sshll.u32 %s2198_s18, 1 }
  0x34   : > { %p46_p5 = scmp.ge.s32.totalorder %s2200_s20, 2  ;;  %s50_s9 = smul.u32 %s1590_s30, %s49_s6 }
  0x35   : > { %s53_s4 = ssub.s32 1, %s1067_s10  ;;  %p1778_p13 = por %p69_p0, %p68_p12 }
  0x36   : > { %s2202_s20 = smov (%p46_p5, %s2200_s20), 0  ;;  %s51_s1 = sadd.s32 %s1586_s29, %s50_s9 }
  0x37   : > { %2145 = sst [smem:[#allocation32_spill]] %s2202_s20  ;;  %s54_s16 = smul.u32 %s53_s4, %s2202_s20 }
  0x38   : > { %s56_s14 = ssub.s32 %s1590_s30, %s2202_s20  ;;  %p74_p3 = scmp.ne.s32.totalorder %s1570_s25, %s1566_s24 }
  0x39   : > { %p85_p10 = scmp.eq.s32.totalorder %s56_s14, 0  ;;  %s55_s6 = sadd.s32 %s54_s16, %s2198_s18 }
  0x3a   : > { %p1790_p1 = por %p186_p4, %p68_p12  ;;  %s57_s27 = ssub.s32 %s51_s1, %s55_s6 }
  0x3b   : > { %p2149_p5 = scmp.eq.s32.totalorder %s1693_s8, 0  ;;  %s58_s29 = sor.u32 %s57_s27, %s56_s14 }
  0x3c   : > { %s2147_s10 = scalar_select %p1790_p1, 1, 0 }
  0x3d   : > { %p1796_p9 = por %p2149_p5, %p74_p3  ;;  %p1802_p0 = por %p1711_p6, %p74_p3 }
  0x3e   : > { %2148 = sst [smem:[#allocation33_spill]] %s2147_s10  ;;  %p59_p8 = scmp.eq.s32.totalorder %s58_s29, 0 }
  0x3f   : > { %s2151_s4 = scalar_select %p1802_p0, 1, 0 }
  0x40   : > { %s264_s16 = sand.u32 1, %s1574_s26   ;;  %s2152_s20 = sadd.s32 1, %s1562_s23 }
  0x41   : > { %s1810_s18 = scalar_select %p85_p10, %s1562_s23, %s2152_s20  }
  0x42   : > { %s1813_s24 = scalar_select %p59_p8, %s1574_s26, %s61_s21  }
  0x43   : > { %2153 = sst [smem:[#allocation34_spill]] %s1810_s18  ;;  %s1072_s6 = sshll.u32 %s264_s16, 3 }
  0x44   : > { %2154 = sst [smem:[#allocation35_spill]] %s1813_s24  ;;  %s1074_s10 = sshll.u32 %s51_s1, 2 }
  0x45   : > { %s1075_s28 = sshll.u32 %s1590_s30, 3  ;;  %s268_s13 = scalar_lea.vmem [#allocation4], %s1072_s6 }
  0x46   : > { %s1816_s22 = sshll.u32 %s268_s13, 4  ;;  %s277_s27 = sadd.s32 %s1075_s28, %s1074_s10  ;;  %s283_s22 = int_to_ptr.vmem [resolvable:$true] %s1816_s22 }
  0x47   : > { %s1076_s12 = sshll.u32 %s277_s27, 1  ;;  %p2155_p4 = scmp.lt.s32.totalorder %s1594_s7, 4 }
  0x48   : > { %s2157_s0 = sld [smem:[#allocation36_spill]]  ;;  %s265_s6 = scalar_lea.sflag [#allocation5], %s264_s16 }
  0x49   : > { %p1823_p6 = pnand %p2155_p4, %p1778_p13 }
  0x4b   : > { %p1318_p10 = pneg %p1823_p6 }
  0x4e   : > { %s279_s21 = scalar_lea.hbm %s2157_s0, %s1076_s12  ;;  %s1321_s10 = scalar_lea.hbm %s2157_s0, 32 }
  0x4f   : > { %s280_s1 = sshll.u32 %s279_s21, 4  ;;  %s281_s1 = int_to_ptr.hbm [resolvable:$true] %s280_s1 }
  0x50   : > { %s1314_s13 = sshra.s32 %s281_s1, 4  ;;  %s1315_s13 = int_to_ptr.hbm [resolvable:$true] %s1314_s13 }
  0x51   : > { %s1316_s24 = scalar_lea.hbm %s1315_s13, 8  ;;  %p1322_p13 = scmp.lt.s32.totalorder %s1315_s13, %s2157_s0 }
  0x52   : > { %p1317_p8 = scmp.ne.s32.totalorder %s1315_s13, %s1316_s24  ;;  %p1323_p5 = scmp.lt.s32.totalorder %s1321_s10, %s1316_s24 }
  0x54   : > { %p1319_p12 = pnand %p1318_p10, %p1317_p8  ;;  %p1324_p4 = por %p1323_p5, %p1322_p13 }
  0x56   : > { %p1320_p3 = pneg %p1319_p12 }
  0x58   : > { %p1325_p0 = pnand %p1324_p4, %p1320_p3 }
  0x5a   : > { %1328 = shalt.err (!%p1325_p0)
}
  0x5b   : > { %s1598_s16 = smov 32   ;;  %s1599_s12 = smov 2  }
  0x5c   : > { %1134 = dma.hbm_to_vmem [thread:$0]  (!%p1823_p6), %s281_s1, 128, %s283_s22, %s265_s6, %s1598_s16, %s1598_s16, %s1599_s12  }
  0x5d   : > { %s1080_s14 = sshll.u32 %s1736_s17, 1  ;;  %s1081_s20 = sshll.u32 %s1590_s30, 1 }
  0x5e   : > { %s2158_s2 = sld [smem:[#allocation38_spill]]  ;;  %s318_s5 = scalar_lea.vmem [#allocation9], %s1080_s14 }
  0x5f   : > { %s326_s28 = sshll.u32 %s318_s5, 4  ;;  %s2159_s3 = sld [smem:[#allocation39_spill]]  ;;  %s327_s28 = int_to_ptr.vmem [resolvable:$true] %s326_s28 }
  0x60   : > { %s337_s22 = scalar_lea.vmem [#allocation10], %s1080_s14  ;;  %s334_s16 = scalar_lea.sflag [#allocation11], %s1736_s17 }
  0x61   : > { %s345_s1 = sshll.u32 %s337_s22, 4  ;;  %s1857_s12 = sand.u32 (!%p1758_p2), 1, %s1570_s25   ;;  %s346_s1 = int_to_ptr.vmem [resolvable:$true] %s345_s1 }
  0x62   : > { %s357_s21 = scalar_lea.sflag (!%p1758_p2), [#allocation5], %s1857_s12 }
  0x64   : > { %s322_s24 = scalar_lea.hbm %s2158_s2, %s1081_s20  ;;  %354 = sbr.rel (%p1758_p2) target bundleno = 2546 (0x9f2), region = 36 }
  0x65   : > { %s324_s13 = sshll.u32 %s322_s24, 4  ;;  %s341_s29 = scalar_lea.hbm %s2159_s3, %s1081_s20  ;;  %s325_s13 = int_to_ptr.hbm [resolvable:$true] %s324_s13 }
  0x66   : > { %1140 = dma.hbm_to_vmem [thread:$0]  (!%p1747_p11), %s325_s13, 32, %s327_s28, %s1753_s19  }
  0x67   : > { %s343_s6 = sshll.u32 %s341_s29, 4  ;;  %s1085_s19 = sshll.u32 (!%p1758_p2), %s1857_s12, 3  ;;  %s344_s6 = int_to_ptr.hbm [resolvable:$true] %s343_s6 }
  0x68   : > { %1143 = dma.hbm_to_vmem [thread:$0]  (!%p1747_p11), %s344_s6, 32, %s346_s1, %s334_s16  }
  0x69   : > { %s1861_s20 = scalar_lea.vmem [#allocation4], %s1085_s19 }
  0x6a   : > { %1533 = dma.done.wait (%p1796_p9), %s357_s21, 128  }
  0x6b   : > { %1535 = vsyncadd (%p1796_p9), %s357_s21, 4294967168  ;;  %s2160_s15 = sld [smem:[#allocation21_spill]]  ;;  %s366_s11 = sand.u32 1, %s1693_s8  }
  0x6c   : > { %s367_s24 = scalar_lea.sflag [#allocation8], %s366_s11 }
  0x71   : > { %s368_s14 = sand.u32 1, %s2160_s15  }
  0x72   : > { %s1086_s26 = sshll.u32 %s368_s14, 5 }
  0x73   : > { %s370_s13 = scalar_lea.vmem [#allocation7], %s1086_s26 }
  0x74   : > { %1537 = dma.done.wait (%p1717_p7), %s367_s24, 544  }
  0x75   : > { %1539 = vsyncadd (%p1717_p7), %s367_s24, 4294966752  ;;  %s1875_s5 = sshll.u32 %s368_s14, 1  ;;  %s387_s28 = scalar_lea.sflag [#allocation11], %s368_s14 }
  0x76   : > { %s380_s9 = scalar_lea.vmem [#allocation9], %s1875_s5  ;;  %s390_s10 = scalar_lea.vmem [#allocation10], %s1875_s5 }
  0x77   : > { %1541 = dma.done.wait (%p1717_p7), %s387_s28, 32  }
  0x78   : > { %1543 = vsyncadd (%p1717_p7), %s387_s28, 4294967264  ;;  %s2162_s27 = sld [smem:[#allocation25_spill]]  ;;  %s1884_s29 = scalar_lea.vmem [#allocation12], %s1085_s19 }
  0x79   : > { %s437_s22 = scalar_lea.vmem [#allocation13], %s1875_s5  ;;  %s2116_s1 = scalar_lea.vmem [#allocation15], %s1875_s5 }
  0x7a   : > { %s2163_s6 = sld [smem:[#allocation24_spill]] }
  0x7e   : > { %p455_p9 = scmp.eq.s32.totalorder %s2162_s27, 0 }
  0x80   : > { %p1092_p11 = scmp.ne.s32.totalorder %s2163_s6, 0 }
  0x82   : > { %459 = sbr.rel (%p1092_p11) target bundleno = 138 (0x8a), region = 56 }
  0x87   : > { %v460_v0 = vld [vmem:[%s380_s9] sm:$0x3]  ;;  %vm461_vm0 = vcmask 254976   ;;  %v463_v1 = vld [vmem:[%s390_s10] sm:$0x3] }
  0x88   : > { %462 = vst.msk [vmem:[#allocation2] sm:$0x3] %vm461_vm0, %v460_v0 }
  0x89   : > { %464 = vst.msk [vmem:[#allocation3] sm:$0x3] %vm461_vm0, %v463_v1 }
  0x8a PF: > { %v468_v2 = vld [vmem:[%s370_s13 + $0x18] sm:$0xff]  ;;  %v467_v3 = vld [vmem:[%s370_s13 + $0x10] sm:$0xff]  ;;  %v466_v4 = vld [vmem:[%s370_s13 + $0x8] sm:$0xff]  ;;  %vm479_vm1 = vcmask 261120   ;;  %s475_s19 = scalar_select %p455_p9, 1, 0 }
  0x8b   : > { %495 = vmatpush.msra.mxu0 %v468_v2  ;;  %563 = vmatpush.msra.mxu1 %v468_v2  ;;  %v465_v5 = vld [vmem:[%s370_s13] sm:$0xff]  ;;  %v1893_v8 = vld [vmem:[%s1861_s20] sm:$0x3]  ;;  %v1896_v9 = vld [vmem:[%s1861_s20 + $0x6] sm:$0x3]  ;;  %s1600_s21 = smov 64  }
  0x8c   : > { %627 = vmatpush.msra.mxu2 %v468_v2  ;;  %691 = vmatpush.msra.mxu3 %v468_v2  ;;  %v476_v7 = vstv %s475_s19  ;;  %s2115_s15 = smov 32   ;;  %v470_v39 = vld [vmem:[%s1861_s20 + $0x2] sm:$0x3]  ;;  %v471_v40 = vld [vmem:[%s1861_s20 + $0x4] sm:$0x3]  ;;  %s1602_s20 = smov 96  }
  0x8d   : > { %496 = vmatpush.msra.mxu0 %v467_v3  ;;  %564 = vmatpush.msra.mxu1 %v467_v3  ;;  %vm1898_vm2 = vcmp.eq.s32.totalorder %v476_v7, 1  ;;  %s2167_s17 = sld [smem:[#allocation24_spill]] }
  0x8e   : > { %628 = vmatpush.msra.mxu2 %v467_v3  ;;  %692 = vmatpush.msra.mxu3 %v467_v3  ;;  %v478_v11 = vsel %vm1898_vm2, %v1893_v8, %v1896_v9  ;;  %v545_v41 = vsel %vm1898_vm2, %v470_v39, %v471_v40  ;;  %v609_v3 = vsel %vm1898_vm2, %v471_v40, %v470_v39 }
  0x8f   : > { %497 = vmatpush.msra.mxu0 %v466_v4  ;;  %v473_v6 = vld [vmem:[#allocation2] sm:$0x3]  ;;  %565 = vmatpush.msra.mxu1 %v466_v4 }
  0x90   : > { %629 = vmatpush.msra.mxu2 %v466_v4  ;;  %693 = vmatpush.msra.mxu3 %v466_v4  ;;  %v474_v15 = vld [vmem:[#allocation3] sm:$0x3] }
  0x91   : > { %498 = vmatpush.msra.mxu0 %v465_v5  ;;  %566 = vmatpush.msra.mxu1 %v465_v5 }
  0x92   : > { %1093 = vmatmul.msk.f32.vlgmr.msra.gmra.mxu0 %vm479_vm1, %v473_v6  ;;  %630 = vmatpush.msra.mxu2 %v465_v5 }
  0x93   : > { %694 = vmatpush.msra.mxu3 %v465_v5  ;;  %p1104_p7 = scmp.ne.s32.totalorder %s2167_s17, 1 }
 0x10f   : > { %v500_v12 = vpop.f32.mrf.mxu0 }
 0x110   : > { %v503_v13 = vadd.f32 %v500_v12, %v478_v11 }
 0x112   : > { %1252 = vtanh.f32 %v503_v13  ;;  %v1094_v16 = vmul.f32 -1.442695, %v503_v13 }
 0x114   : > { %1254 = vpow2.f32 %v1094_v16 }
 0x118   : > { %v1253_v14 = vpop.eup %1252 }
 0x119   : > { %530 = vrot.lane.b32.xlu0 %v1253_v14, %s1600_s21 }
 0x11a   : > { %v1255_v17 = vpop.eup %1254 }
 0x11b   : > { %v507_v18 = vadd.f32 1.0, %v1255_v17 }
 0x11d   : > { %1256 = vrcp.f32 %v507_v18  ;;  %v519_v24 = vand.u32 2147483648, %v507_v18  ;;  %vm513_vm4 = vweird.f32 %v507_v18  ;;  %v517_v25 = vand.u32 2147483647, %v507_v18 }
 0x11f   : > { %v520_v27 = vor.u32 1.1754944e-38, %v519_v24  ;;  %vm518_vm6 = vcmp.eq.f32.partialorder %v517_v25, 8.507059e+37 }
 0x121   : > { %525 = vrot.lane.b32.xlu0 %v474_v15, %s2115_s15 }
 0x123   : > { %v1257_v19 = vpop.eup %1256 }
 0x124   : > { %v509_v20 = vmul.f32 %v1257_v19, %v507_v18  ;;  %vm514_vm3 = vweird.f32 %v1257_v19 }
 0x125   : > { %vm515_vm5 = vmor %vm513_vm4, %vm514_vm3  ;;  %vm741_vm4 = vcmask 254976  }
 0x126   : > { %v510_v21 = vsub.f32 1.0, %v509_v20 }
 0x128   : > { %v511_v22 = vmul.f32 %v1257_v19, %v510_v21 }
 0x12a   : > { %v512_v23 = vadd.f32 %v1257_v19, %v511_v22 }
 0x12c   : > { %v516_v26 = vsel %vm515_vm5, %v1257_v19, %v512_v23 }
 0x12d   : > { %v521_v29 = vsel %vm518_vm6, %v520_v27, %v516_v26 }
 0x18b   : > { %v531_v28 = vpop.permute.xlu0 %530 }
 0x18c   : > { %v533_v30 = vmul.f32 %v531_v28, %v521_v29 }
 0x18e   : > { %535 = vrot.lane.b32.xlu1 %v533_v30, %s2115_s15 }
 0x193   : > { %v526_v31 = vpop.permute.xlu0 %525 }
 0x194   : > { %v528_v32 = vmul.f32 %v526_v31, %v521_v29 }
 0x200   : > { %v536_v33 = vpop.permute.xlu1 %535 }
 0x201   : > { %v538_v34 = vadd.f32 %v536_v33, %v528_v32  ;;  %v673_v32 = vsel %vm1898_vm2, %v1896_v9, %v1893_v8 }
 0x203   : > { %1258 = vtanh.f32 %v538_v34 }
 0x209   : > { %v1259_v35 = vpop.eup %1258 }
 0x20a   : > { %541 = vrot.lane.b32.xlu1 %v1259_v35, %s1600_s21 }
 0x27c   : > { %v542_v36 = vpop.permute.xlu1 %541 }
 0x27d   : > { %v1910_v37 = vmul.f32 %v542_v36, %v521_v29 }
 0x27f   : > { %547 = vrot.lane.b32.xlu2 %v1910_v37, %s2115_s15 }
 0x2d9   : > { %v548_v38 = vpop.permute.xlu2 %547 }
 0x2da   : > { %1095 = vmatmul.msk.f32.vlgmr.msra.gmra.mxu1 %vm479_vm1, %v548_v38 }
 0x357   : > { %v568_v42 = vpop.f32.mrf.mxu1 }
 0x358   : > { %v571_v43 = vadd.f32 %v568_v42, %v545_v41 }
 0x35a   : > { %1260 = vtanh.f32 %v571_v43  ;;  %v1096_v45 = vmul.f32 -1.442695, %v571_v43 }
 0x35c   : > { %1262 = vpow2.f32 %v1096_v45 }
 0x360   : > { %v1261_v44 = vpop.eup %1260 }
 0x361   : > { %594 = vrot.lane.b32.xlu2 %v1261_v44, %s1600_s21 }
 0x362   : > { %v1263_v46 = vpop.eup %1262 }
 0x363   : > { %v575_v47 = vadd.f32 1.0, %v1263_v46 }
 0x365   : > { %1264 = vrcp.f32 %v575_v47  ;;  %v587_v53 = vand.u32 2147483648, %v575_v47  ;;  %vm581_vm8 = vweird.f32 %v575_v47  ;;  %v585_v54 = vand.u32 2147483647, %v575_v47 }
 0x367   : > { %v588_v56 = vor.u32 1.1754944e-38, %v587_v53  ;;  %vm586_vm10 = vcmp.eq.f32.partialorder %v585_v54, 8.507059e+37 }
 0x36b   : > { %v1265_v48 = vpop.eup %1264 }
 0x36c   : > { %v577_v49 = vmul.f32 %v1265_v48, %v575_v47  ;;  %vm582_vm7 = vweird.f32 %v1265_v48 }
 0x36d   : > { %vm583_vm9 = vmor %vm581_vm8, %vm582_vm7 }
 0x36e   : > { %v578_v50 = vsub.f32 1.0, %v577_v49 }
 0x370   : > { %v579_v51 = vmul.f32 %v1265_v48, %v578_v50 }
 0x372   : > { %v580_v52 = vadd.f32 %v1265_v48, %v579_v51 }
 0x374   : > { %v584_v55 = vsel %vm583_vm9, %v1265_v48, %v580_v52 }
 0x375   : > { %v589_v58 = vsel %vm586_vm10, %v588_v56, %v584_v55 }
 0x376   : > { %v592_v60 = vmul.f32 %v589_v58, %v538_v34 }
 0x3bb   : > { %v595_v57 = vpop.permute.xlu2 %594 }
 0x3bc   : > { %v597_v59 = vmul.f32 %v595_v57, %v589_v58 }
 0x3be   : > { %599 = vrot.lane.b32.xlu0 %v597_v59, %s2115_s15 }
 0x430   : > { %v600_v61 = vpop.permute.xlu0 %599 }
 0x431   : > { %v602_v62 = vadd.f32 %v600_v61, %v592_v60 }
 0x433   : > { %1266 = vtanh.f32 %v602_v62 }
 0x439   : > { %v1267_v63 = vpop.eup %1266 }
 0x43a   : > { %605 = vrot.lane.b32.xlu1 %v1267_v63, %s1600_s21 }
 0x4ac   : > { %v606_v0 = vpop.permute.xlu1 %605 }
 0x4ad   : > { %v1922_v1 = vmul.f32 %v606_v0, %v589_v58 }
 0x4af   : > { %611 = vrot.lane.b32.xlu2 %v1922_v1, %s2115_s15 }
 0x509   : > { %v612_v2 = vpop.permute.xlu2 %611 }
 0x50a   : > { %1097 = vmatmul.msk.f32.vlgmr.msra.gmra.mxu2 %vm479_vm1, %v612_v2 }
 0x58d   : > { %v632_v4 = vpop.f32.mrf.mxu2 }
 0x58e   : > { %v635_v5 = vadd.f32 %v632_v4, %v609_v3 }
 0x590   : > { %1268 = vtanh.f32 %v635_v5  ;;  %v1098_v7 = vmul.f32 -1.442695, %v635_v5 }
 0x592   : > { %1270 = vpow2.f32 %v1098_v7 }
 0x596   : > { %v1269_v6 = vpop.eup %1268 }
 0x597   : > { %658 = vrot.lane.b32.xlu0 %v1269_v6, %s1600_s21 }
 0x598   : > { %v1271_v11 = vpop.eup %1270 }
 0x599   : > { %v639_v12 = vadd.f32 1.0, %v1271_v11 }
 0x59b   : > { %1272 = vrcp.f32 %v639_v12  ;;  %v651_v18 = vand.u32 2147483648, %v639_v12  ;;  %vm645_vm12 = vweird.f32 %v639_v12  ;;  %v649_v19 = vand.u32 2147483647, %v639_v12 }
 0x59d   : > { %v652_v21 = vor.u32 1.1754944e-38, %v651_v18  ;;  %vm650_vm14 = vcmp.eq.f32.partialorder %v649_v19, 8.507059e+37 }
 0x5a1   : > { %v1273_v13 = vpop.eup %1272 }
 0x5a2   : > { %v641_v14 = vmul.f32 %v1273_v13, %v639_v12  ;;  %vm646_vm11 = vweird.f32 %v1273_v13 }
 0x5a3   : > { %vm647_vm13 = vmor %vm645_vm12, %vm646_vm11 }
 0x5a4   : > { %v642_v15 = vsub.f32 1.0, %v641_v14 }
 0x5a6   : > { %v643_v16 = vmul.f32 %v1273_v13, %v642_v15 }
 0x5a8   : > { %v644_v17 = vadd.f32 %v1273_v13, %v643_v16 }
 0x5aa   : > { %v648_v20 = vsel %vm647_vm13, %v1273_v13, %v644_v17 }
 0x5ab   : > { %v653_v23 = vsel %vm650_vm14, %v652_v21, %v648_v20 }
 0x5ac   : > { %v656_v25 = vmul.f32 %v653_v23, %v602_v62 }
 0x609   : > { %v659_v22 = vpop.permute.xlu0 %658 }
 0x60a   : > { %v661_v24 = vmul.f32 %v659_v22, %v653_v23 }
 0x60c   : > { %663 = vrot.lane.b32.xlu1 %v661_v24, %s2115_s15 }
 0x67e   : > { %v664_v26 = vpop.permute.xlu1 %663 }
 0x67f   : > { %v666_v27 = vadd.f32 %v664_v26, %v656_v25 }
 0x681   : > { %1274 = vtanh.f32 %v666_v27 }
 0x687   : > { %v1275_v28 = vpop.eup %1274 }
 0x688   : > { %669 = vrot.lane.b32.xlu2 %v1275_v28, %s1600_s21 }
 0x6e2   : > { %v670_v29 = vpop.permute.xlu2 %669 }
 0x6e3   : > { %v672_v30 = vmul.f32 %v670_v29, %v653_v23 }
 0x6e5   : > { %675 = vrot.lane.b32.xlu0 %v672_v30, %s2115_s15  ;;  %v761_v54 = vsel %vm1898_vm2, %v672_v30, %v1922_v1  ;;  %v754_v60 = vsel %vm1898_vm2, %v1922_v1, %v672_v30 }
 0x757   : > { %v676_v31 = vpop.permute.xlu0 %675 }
 0x758   : > { %1099 = vmatmul.msk.f32.vlgmr.msra.gmra.mxu3 %vm479_vm1, %v676_v31 }
 0x7db   : > { %v696_v33 = vpop.f32.mrf.mxu3 }
 0x7dc   : > { %v699_v34 = vadd.f32 %v696_v33, %v673_v32 }
 0x7de   : > { %1276 = vtanh.f32 %v699_v34  ;;  %v1100_v36 = vmul.f32 -1.442695, %v699_v34 }
 0x7e0   : > { %1278 = vpow2.f32 %v1100_v36 }
 0x7e4   : > { %v1277_v35 = vpop.eup %1276 }
 0x7e5   : > { %722 = vrot.lane.b32.xlu1 %v1277_v35, %s1600_s21 }
 0x7e6   : > { %v1279_v38 = vpop.eup %1278 }
 0x7e7   : > { %v703_v39 = vadd.f32 1.0, %v1279_v38 }
 0x7e9   : > { %1280 = vrcp.f32 %v703_v39  ;;  %v715_v45 = vand.u32 2147483648, %v703_v39  ;;  %vm709_vm0 = vweird.f32 %v703_v39  ;;  %v713_v8 = vand.u32 2147483647, %v703_v39 }
 0x7eb   : > { %v716_v46 = vor.u32 1.1754944e-38, %v715_v45  ;;  %vm714_vm3 = vcmp.eq.f32.partialorder %v713_v8, 8.507059e+37 }
 0x7ef   : > { %v1281_v40 = vpop.eup %1280 }
 0x7f0   : > { %v705_v41 = vmul.f32 %v1281_v40, %v703_v39  ;;  %vm710_vm15 = vweird.f32 %v1281_v40 }
 0x7f1   : > { %vm711_vm1 = vmor %vm709_vm0, %vm710_vm15 }
 0x7f2   : > { %v706_v42 = vsub.f32 1.0, %v705_v41 }
 0x7f4   : > { %v707_v43 = vmul.f32 %v1281_v40, %v706_v42 }
 0x7f6   : > { %v708_v44 = vadd.f32 %v1281_v40, %v707_v43 }
 0x7f8   : > { %v712_v9 = vsel %vm711_vm1, %v1281_v40, %v708_v44 }
 0x7f9   : > { %v717_v48 = vsel %vm714_vm3, %v716_v46, %v712_v9 }
 0x7fa   : > { %v720_v50 = vmul.f32 %v717_v48, %v666_v27 }
 0x857   : > { %v723_v47 = vpop.permute.xlu1 %722 }
 0x858   : > { %v725_v49 = vmul.f32 %v723_v47, %v717_v48 }
 0x85a   : > { %727 = vrot.lane.b32.xlu2 %v725_v49, %s2115_s15 }
 0x8b4   : > { %v728_v51 = vpop.permute.xlu2 %727 }
 0x8b5   : > { %v730_v52 = vadd.f32 %v728_v51, %v720_v50 }
 0x8b7   : > { %1282 = vtanh.f32 %v730_v52  ;;  %744 = vrot.lane.b32.xlu2 %v730_v52, %s1602_s20 }
 0x8bd   : > { %v1283_v53 = vpop.eup %1282 }
 0x8be   : > { %733 = vrot.lane.b32.xlu0 %v1283_v53, %s1600_s21 }
 0x8bf   : > { %763 = vrot.lane.b32.xlu2 %v761_v54, %s2115_s15 }
 0x911   : > { %v745_v55 = vpop.permute.xlu2 %744 }
 0x912   : > { %747 = vst.msk [vmem:[#allocation3] sm:$0x3] %vm741_vm4, %v745_v55 }
 0x919   : > { %v764_v56 = vpop.permute.xlu2 %763 }
 0x91a   : > { %1102 = vst.msk [vmem:[%s1884_s29 + $0x4] sm:$0x3] %vm741_vm4, %v764_v56 }
 0x930   : > { %v734_v57 = vpop.permute.xlu0 %733 }
 0x931   : > { %v736_v58 = vmul.f32 %v734_v57, %v717_v48 }
 0x933   : > { %738 = vrot.lane.b32.xlu1 %v736_v58, %s2115_s15  ;;  %v748_v59 = vsel %vm1898_vm2, %v1910_v37, %v736_v58  ;;  %v768_v61 = vsel %vm1898_vm2, %v736_v58, %v1910_v37 }
 0x934   : > { %750 = vrot.lane.b32.xlu0 %v748_v59, %s2115_s15 }
 0x93b   : > { %756 = vrot.lane.b32.xlu1 %v754_v60, %s2115_s15 }
 0x93c   : > { %770 = vrot.lane.b32.xlu0 %v768_v61, %s2115_s15 }
 0x9a5   : > { %v739_v62 = vpop.permute.xlu1 %738 }
 0x9a6   : > { %742 = vst.msk [vmem:[#allocation2] sm:$0x3] %vm741_vm4, %v739_v62  ;;  %v751_v63 = vpop.permute.xlu0 %750 }
 0x9a7   : > { %753 = vst.msk [vmem:[%s1884_s29] sm:$0x3] %vm741_vm4, %v751_v63 }
 0x9ab   : > { %778 = sbr.rel (%p1104_p7) target bundleno = 2483 (0x9b3), region = 60 }
 0x9ad   : > { %v757_v0 = vpop.permute.xlu1 %756 }
 0x9ae   : > { %1101 = vst.msk [vmem:[%s1884_s29 + $0x2] sm:$0x3] %vm741_vm4, %v757_v0  ;;  %v771_v2 = vpop.permute.xlu0 %770 }
 0x9af   : > { %1103 = vst.msk [vmem:[%s1884_s29 + $0x6] sm:$0x3] %vm741_vm4, %v771_v2 }
 0x9b0   : > { %v779_v1 = vld [vmem:[#allocation2] sm:$0x3]  ;;  %v781_v10 = vld [vmem:[#allocation3] sm:$0x3] }
 0x9b1   : > { %780 = vst.msk [vmem:[%s437_s22] sm:$0x3] %vm741_vm4, %v779_v1 }
 0x9b2   : > { %782 = vst.msk [vmem:[%s2116_s1] sm:$0x3] %vm741_vm4, %v781_v10 }
 0x9b3 PF: > { %s2168_s14 = sld [smem:[#allocation25_spill]]  ;;  %s829_s6 = sshll.u32 %s437_s22, 4  ;;  %s830_s6 = int_to_ptr.vmem [resolvable:$true] %s829_s6 }
 0x9b4   : > { %s2169_s26 = sld [smem:[#allocation29_spill]]  ;;  %s1983_s19 = scalar_lea.sflag [#allocation14], %s366_s11 }
 0x9b5   : > { %s2170_s28 = sld [smem:[#allocation41_spill]] }
 0x9b9   : > { %s1112_s24 = sshll.u32 %s2168_s14, 1 }
 0x9ba   : > { %p2172_p0 = scmp.ne.s32.totalorder %s2169_s26, 0 }
 0x9bb   : > { %s2171_s10 = smov %s2170_s28  ;;  %s827_s27 = scalar_lea.hbm %s2170_s28, %s1112_s24 }
 0x9bc   : > { %s831_s16 = sshll.u32 %s827_s27, 4  ;;  %s1424_s13 = scalar_lea.hbm %s2171_s10, 4  ;;  %s832_s16 = int_to_ptr.hbm [resolvable:$true] %s831_s16 }
 0x9bd   : > { %s1418_s21 = sshra.s32 %s832_s16, 4  ;;  %s1419_s21 = int_to_ptr.hbm [resolvable:$true] %s1418_s21 }
 0x9be   : > { %s1420_s20 = scalar_lea.hbm %s1419_s21, 2  ;;  %p1425_p10 = scmp.lt.s32.totalorder %s1419_s21, %s2171_s10 }
 0x9bf   : > { %p1421_p2 = scmp.ne.s32.totalorder %s1419_s21, %s1420_s20  ;;  %p1426_p12 = scmp.lt.s32.totalorder %s1424_s13, %s1420_s20 }
 0x9c1   : > { %p1422_p6 = pnand %p1421_p2, %p2172_p0  ;;  %p1427_p3 = por %p1426_p12, %p1425_p10 }
 0x9c3   : > { %p1423_p8 = pneg %p1422_p6 }
 0x9c5   : > { %p1428_p13 = pnand %p1427_p3, %p1423_p8 }
 0x9c7   : > { %1431 = shalt.err (!%p1428_p13)
}
 0x9c8   : > { %s2173_s8 = sld [smem:[#allocation24_spill]]  ;;  %s812_s15 = sshll.u32 %s1884_s29, 4  ;;  %s2004_s15 = int_to_ptr.vmem [resolvable:$true] %s812_s15 }
 0x9c9   : > { %1126 = dma.vmem_to_hbm [thread:$0]  (%p2172_p0), %s830_s6, 32, %s832_s16, %s1983_s19  }
 0x9ca   : > { %s1110_s21 = sshll.u32 %s2168_s14, 3  ;;  %s2174_s13 = sld [smem:[#allocation42_spill]] }
 0x9cb   : > { %s2176_s2 = scalar_lea.vmem [#allocation15], %s1875_s5 }
 0x9cc   : > { %s2008_s3 = sshll.u32 %s2176_s2, 4  ;;  %s844_s3 = int_to_ptr.vmem [resolvable:$true] %s2008_s3 }
 0x9ce   : > { %s1108_s11 = sshll.u32 %s2173_s8, 1 }
 0x9cf   : > { %s802_s22 = ssub.s32 1, %s1108_s11 }
 0x9d0   : > { %s803_s27 = smul.u32 %s2168_s14, %s802_s22  ;;  %s841_s9 = scalar_lea.hbm %s2174_s13, %s1112_s24 }
 0x9d1   : > { %s845_s16 = sshll.u32 %s841_s9, 4  ;;  %s2177_s22 = sld [smem:[#allocation40_spill]]  ;;  %s2014_s16 = int_to_ptr.hbm [resolvable:$true] %s845_s16 }
 0x9d2   : > { %s804_s28 = sadd.s32 %s2173_s8, %s803_s27  ;;  %s784_s24 = scalar_lea.sflag [#allocation6], %s1857_s12 }
 0x9d3   : > { %s1109_s0 = sshll.u32 %s804_s28, 2 }
 0x9d4   : > { %s809_s6 = sadd.s32 %s1110_s21, %s1109_s0 }
 0x9d5   : > { %s1111_s11 = sshll.u32 %s809_s6, 1 }
 0x9d7   : > { %s2178_s18 = smov %s2177_s22  ;;  %s811_s14 = scalar_lea.hbm %s2177_s22, %s1111_s11 }
 0x9d8   : > { %s814_s30 = sshll.u32 %s811_s14, 4  ;;  %s1452_s5 = scalar_lea.hbm %s2178_s18, 32  ;;  %s815_s30 = int_to_ptr.hbm [resolvable:$true] %s814_s30 }
 0x9d9   : > { %s1446_s8 = sshra.s32 %s815_s30, 4  ;;  %s1447_s8 = int_to_ptr.hbm [resolvable:$true] %s1446_s8 }
 0x9da   : > { %s1448_s27 = scalar_lea.hbm %s1447_s8, 8  ;;  %p1453_p11 = scmp.lt.s32.totalorder %s1447_s8, %s2178_s18 }
 0x9db   : > { %p1449_p5 = scmp.ne.s32.totalorder %s1447_s8, %s1448_s27  ;;  %p1454_p7 = scmp.lt.s32.totalorder %s1452_s5, %s1448_s27 }
 0x9dd   : > { %p1450_p4 = pnand %p1449_p5, %p1790_p1  ;;  %p1455_p2 = por %p1454_p7, %p1453_p11 }
 0x9df   : > { %p1451_p9 = pneg %p1450_p4 }
 0x9e1   : > { %p1456_p6 = pnand %p1455_p2, %p1451_p9 }
 0x9e3   : > { %1459 = shalt.err (!%p1456_p6)
}
 0x9e4   : > { %s1603_s12 = smov 2   ;;  %s2179_s20 = smov 32  }
 0x9e5   : > { %1125 = dma.vmem_to_hbm [thread:$0]  (%p1790_p1), %s2004_s15, 128, %s815_s30, %s784_s24, %s2179_s20, %s2179_s20, %s1603_s12  }
 0x9e6   : > { %s1474_s17 = sshra.s32 %s2014_s16, 4  ;;  %s1480_s11 = scalar_lea.hbm %s2174_s13, 4  ;;  %s1475_s17 = int_to_ptr.hbm [resolvable:$true] %s1474_s17 }
 0x9e7   : > { %s1476_s9 = scalar_lea.hbm %s1475_s17, 2  ;;  %p1481_p3 = scmp.lt.s32.totalorder %s1475_s17, %s2174_s13 }
 0x9e8   : > { %p1477_p8 = scmp.ne.s32.totalorder %s1475_s17, %s1476_s9  ;;  %p1482_p13 = scmp.lt.s32.totalorder %s1480_s11, %s1476_s9 }
 0x9ea   : > { %p1478_p10 = pnand %p1477_p8, %p2172_p0  ;;  %p1483_p5 = por %p1482_p13, %p1481_p3 }
 0x9ec   : > { %p1479_p12 = pneg %p1478_p10 }
 0x9ee   : > { %p1484_p4 = pnand %p1483_p5, %p1479_p12 }
 0x9f0   : > { %1487 = shalt.err (!%p1484_p4)
}
 0x9f1   : > { %1127 = dma.vmem_to_hbm [thread:$0]  (%p2172_p0), %s844_s3, 32, %s2014_s16, %s1983_s19  }
 0x9f2 PF: > { %s2180_s30 = sld [smem:[#allocation22_spill]]  ;;  %p1155_p1 = scmp.ge.s32.totalorder %s1594_s7, 2 }
 0x9f3   : > { %p2181_p9 = scmp.ne.s32.totalorder %s2151_s4, 0 }
 0x9f5   : > { %p1145_p11 = pnand %p1155_p1, %p2181_p9 }
 0x9f7   : > { %p1146_p7 = pneg %p1145_p11 }
 0x9f8   : > { %s857_s1 = sand.u32 1, %s2180_s30  }
 0x9f9   : > { %s858_s15 = scalar_lea.sflag [#allocation6], %s857_s1 }
 0x9fa   : > { %1545 = dma.done.wait (%p1146_p7), %s858_s15, 128  }
 0x9fb   : > { %1547 = vsyncadd (%p1146_p7), %s858_s15, 4294967168  ;;  %s2182_s14 = sadd.s32 4294967294, %s1594_s7   ;;  %s2183_s26 = sld [smem:[#allocation30_spill]] }
 0x9fc   : > { %s867_s24 = sand.u32 1, %s2182_s14  }
 0x9fd   : > { %s868_s3 = scalar_lea.sflag [#allocation14], %s867_s24 }
 0xa01   : > { %p2184_p2 = scmp.ne.s32.totalorder %s2183_s26, 0 }
 0xa03   : > { %p1148_p6 = pnand %p1155_p1, %p2184_p2 }
 0xa05   : > { %p1149_p8 = pneg %p1148_p6 }
 0xa07   : > { %1549 = dma.done.wait (%p1149_p8), %s868_s3, 64  }
 0xa08   : > { %1551 = vsyncadd (%p1149_p8), %s868_s3, 4294967232  ;;  %s32_s7 = sadd.s32 1, %s1594_s7   ;;  %s2185_s21 = sld [smem:[#allocation21_spill]] }
 0xa09   : > { %p29_p0 = scmp.ge.s32.totalorder %s32_s7, 6   ;;  %s2186_s4 = sld [smem:[#allocation34_spill]] }
 0xa0a   : > { %s2187_s19 = sld [smem:[#allocation23_spill]]  ;;  %s2193_s22 = smov %s1562_s23 }
 0xa0b   : > { %s2188_s26 = sld [smem:[#allocation35_spill]]  ;;  %s2195_s24 = smov %s1570_s25 }
 0xa0c   : > { %s2189_s27 = sld [smem:[#allocation26_spill]]  ;;  %31 = sbr.rel (!%p29_p0) target bundleno = 23 (0x17), region = 161 }
 0xa0d   : > { %s2190_s28 = sld [smem:[#allocation27_spill]] }
 0xa0e   : > { %s2191_s29 = sld [smem:[#allocation31_spill]] }
 0xa0f   : > { %s2192_s30 = sld [smem:[#allocation32_spill]]  ;;  %s2194_s23 = smov %s2186_s4 }
 0xa10   : > { %s2196_s25 = smov %s2187_s19 }
 0xa11   :  { %884 = vsyncpa [#allocation5], 1 }
 0xa12   :  { %886 = vsyncpa [#allocation5 + $0x1], 1 }
 0xa13   :  { %887 = vsyncpa [#allocation8], 1 }
 0xa14   :  { %889 = vsyncpa [#allocation8 + $0x1], 1 }
 0xa15   :  { %890 = vsyncpa [#allocation11], 1 }
 0xa16   :  { %892 = vsyncpa [#allocation11 + $0x1], 1 }
 0xa17   :  { %893 = vsyncpa [#allocation6], 1 }
 0xa18   :  { %895 = vsyncpa [#allocation6 + $0x1], 1 }
 0xa19   :  { %896 = vsyncpa [#allocation14], 1 }
 0xa1a   :  { %898 = vsyncpa [#allocation14 + $0x1], 1 }

</bundles_post_ra>
